<compile_context>
chip_gen: v7x
topology: tpu7x:2x2x1
jax: 0.10.0
libtpu: 0.0.40
codegen_flags: <defaults>
</compile_context>

<pallas_src>
import jax
import jax.numpy as jnp
from jax.experimental import pallas as pl
from jax.experimental.pallas import tpu as pltpu


def _round_up(x, m):
    return ((x + m - 1) // m) * m


# ---------------------------------------------------------------------------
# Kernels
# ---------------------------------------------------------------------------
def _linear_small_kernel(x_ref, wt_ref, b_ref, o_ref):
    """Fast path: whole problem resident in VMEM (no grid, no pipelining)."""
    o_ref[...] = (
        jnp.dot(x_ref[...], wt_ref[...], preferred_element_type=jnp.float32)
        + b_ref[...]
    ).astype(o_ref.dtype)


def _linear_tiled_kernel(x_ref, wt_ref, b_ref, o_ref):
    """One (tm, tn) output tile, accumulated over the K grid axis.

    x_ref : (tm, tk)  activation tile
    wt_ref: (tk, tn)  weight tile, pre-transposed (Din, Dout) -> canonical MXU RHS
    b_ref : (1,  tn)  bias tile
    o_ref : (tm, tn)  fp32 output tile; K-invariant block index -> stays resident
                      in VMEM across K and is used directly as the accumulator.
    """
    k = pl.program_id(2)
    partial = jnp.dot(x_ref[...], wt_ref[...], preferred_element_type=jnp.float32)

    @pl.when(k == 0)
    def _():
        # Fold the bias into the first K step (added exactly once).
        o_ref[...] = partial + b_ref[...]

    @pl.when(k > 0)
    def _():
        o_ref[...] += partial


# ---------------------------------------------------------------------------
# Wrapper (DummyModel.forward equivalent)
# ---------------------------------------------------------------------------
def dummy_model_forward(x, weight, bias, *, tm=512, tn=512, tk=1024):
    """nn.Linear(input_dim, output_dim)(x) == x @ weight.T + bias.

    x:      (B, Din)      float32
    weight: (Dout, Din)   float32 (PyTorch layout)
    bias:   (Dout,)       float32
    returns (B, Dout)     float32
    """
    B, Din = x.shape
    Dout, Din_w = weight.shape
    assert Din == Din_w and bias.shape == (Dout,)
    out_dtype = x.dtype  # fp32 for DummyModel; tiled path accumulates in o_ref.

    # One-time layout fix in the wrapper: (Dout, Din) -> (Din, Dout) so the
    # kernel RHS is pushed to the MXU as (K, N) with N on lanes.
    wt = weight.T
    b2d = bias.reshape(1, Dout)

    # Clamp tiles to the problem; keep tn a multiple of 128 (lane-dense stores)
    # and tm a multiple of 8.  If K fits one block, use tk == Din -> no K pad.
    tm = min(tm, _round_up(B, 8))
    tn = min(tn, _round_up(Dout, 128))
    if Din <= tk:
        tk = Din

    grid_m = pl.cdiv(B, tm)
    grid_n = pl.cdiv(Dout, tn)
    grid_k = pl.cdiv(Din, tk)

    # ---- fast path: single block, skip grid / pipeline / pad machinery ------
    if grid_m == 1 and grid_n == 1 and grid_k == 1:
        return pl.pallas_call(
            _linear_small_kernel,
            out_shape=jax.ShapeDtypeStruct((B, Dout), out_dtype),
        )(x, wt, b2d)

    # ---- v7x: make sure a "parallel" axis has >= 2 blocks (2 TensorCores) ---
    if grid_m == 1 and grid_n == 1 and Dout > 128:
        tn = _round_up(pl.cdiv(Dout, 2), 128)
        grid_n = pl.cdiv(Dout, tn)

    # Only the reduction (K) dim must be zero-padded; M/N edge blocks are
    # handled by Pallas (out-of-bounds output writes are discarded).
    Kp = _round_up(Din, tk)
    if Kp != Din:
        x = jnp.pad(x, ((0, 0), (0, Kp - Din)))
        wt = jnp.pad(wt, ((0, Kp - Din), (0, 0)))
    grid_k = Kp // tk

    grid = (grid_m, grid_n, grid_k)

    return pl.pallas_call(
        _linear_tiled_kernel,
        out_shape=jax.ShapeDtypeStruct((B, Dout), out_dtype),
        grid_spec=pltpu.PrefetchScalarGridSpec(
            num_scalar_prefetch=0,
            grid=grid,
            in_specs=[
                pl.BlockSpec((tm, tk), lambda i, j, k: (i, k)),   # x tile
                pl.BlockSpec((tk, tn), lambda i, j, k: (k, j)),   # W^T tile
                pl.BlockSpec((1, tn), lambda i, j, k: (0, j)),    # bias tile
            ],
            out_specs=pl.BlockSpec((tm, tn), lambda i, j, k: (i, j)),
        ),
        compiler_params=pltpu.CompilerParams(
            dimension_semantics=("parallel", "parallel", "arbitrary"),
            vmem_limit_bytes=32 * 1024 * 1024),
        cost_estimate=pl.CostEstimate(
            flops=2 * B * Din * Dout,
            transcendentals=0,
            bytes_accessed=4 * (B * Din + Din * Dout + B * Dout + Dout)),
    )(x, wt, b2d)


if __name__ == "__main__":
    # Small shapes consistent with nn.Linear(input_dim, output_dim).
    batch, input_dim, output_dim = 8, 32, 16

    key = jax.random.PRNGKey(0)
    kx, kw, kb = jax.random.split(key, 3)

    x = jax.random.normal(kx, (batch, input_dim), dtype=jnp.float32)
    bound = 1.0 / (input_dim ** 0.5)  # PyTorch-style uniform init bound
    weight = jax.random.uniform(kw, (output_dim, input_dim),
                                minval=-bound, maxval=bound, dtype=jnp.float32)
    bias = jax.random.uniform(kb, (output_dim,),
                              minval=-bound, maxval=bound, dtype=jnp.float32)

    out = jax.block_until_ready(dummy_model_forward(x, weight, bias))
    ref = x @ weight.T + bias
    assert out.shape == (batch, output_dim)
    assert jnp.allclose(out, ref, atol=1e-5, rtol=1e-5)

    # Also exercise the tiled path (multi-block M/N with edge tiles, K padding,
    # multi-step accumulation into the resident output tile).
    B2, D2in, D2out = 640, 2304, 768
    k2x, k2w, k2b = jax.random.split(jax.random.PRNGKey(1), 3)
    x2 = jax.random.normal(k2x, (B2, D2in), dtype=jnp.float32)
    bound2 = 1.0 / (D2in ** 0.5)
    w2 = jax.random.uniform(k2w, (D2out, D2in),
                            minval=-bound2, maxval=bound2, dtype=jnp.float32)
    bias2 = jax.random.uniform(k2b, (D2out,),
                               minval=-bound2, maxval=bound2, dtype=jnp.float32)
    out2 = jax.block_until_ready(dummy_model_forward(x2, w2, bias2))
    ref2 = x2 @ w2.T + bias2
    assert out2.shape == (B2, D2out)
    # Looser tolerance: default-precision MXU matmul + different K accumulation
    # order between the tiled kernel and XLA's reference dot.
    assert jnp.allclose(out2, ref2, atol=1e-2, rtol=1e-2)

    print("KERNEL_OK")
</pallas_src>

<mosaic_0001>
module attributes {stable_mosaic.version = 11 : i64} {
  func.func @_linear_small_kernel(%arg0: memref<8x32xf32, #tpu.memory_space<vmem>>, %arg1: memref<32x16xf32, #tpu.memory_space<vmem>>, %arg2: memref<1x16xf32, #tpu.memory_space<vmem>>, %arg3: memref<8x16xf32, #tpu.memory_space<vmem>>) attributes {dimension_semantics = [], scalar_prefetch = 0 : i64, scratch_operands = 0 : i64, tpu.core_type = #tpu.core_type<tc>} {
    %c0 = arith.constant 0 : index
    %c0_0 = arith.constant 0 : index
    %0 = vector.load %arg0[%c0, %c0_0] : memref<8x32xf32, #tpu.memory_space<vmem>>, vector<8x32xf32>
    %c0_1 = arith.constant 0 : index
    %c0_2 = arith.constant 0 : index
    %1 = vector.load %arg1[%c0_1, %c0_2] : memref<32x16xf32, #tpu.memory_space<vmem>>, vector<32x16xf32>
    %cst = arith.constant dense<0.000000e+00> : vector<8x16xf32>
    %2 = tpu.matmul %0, %1, %cst {dimension_numbers = #tpu.dot_dimension_numbers<[1], [0], [0], [1], [0, 0, 1, 1], [], []>} : vector<8x32xf32>, vector<32x16xf32>, vector<8x16xf32> -> vector<8x16xf32>
    %c0_3 = arith.constant 0 : index
    %c0_4 = arith.constant 0 : index
    %3 = vector.load %arg2[%c0_3, %c0_4] : memref<1x16xf32, #tpu.memory_space<vmem>>, vector<1x16xf32>
    %4 = vector.broadcast %3 : vector<1x16xf32> to vector<8x16xf32>
    %5 = arith.addf %2, %4 : vector<8x16xf32>
    %c0_5 = arith.constant 0 : index
    %c0_6 = arith.constant 0 : index
    %6 = vector.load %arg3[%c0_5, %c0_6] : memref<8x16xf32, #tpu.memory_space<vmem>>, vector<8x16xf32>
    tpu.vector_store %arg3[%c0_5, %c0_6], %5 {strides = array<i32>} : memref<8x16xf32, #tpu.memory_space<vmem>>, vector<8x16xf32>,
    return
  }
}

</mosaic_0001>

<bundles_post_ra>
// kernel: tpu_custom_call.1
= control target key start
LH: loop header
LB: loop body
LE: loop exit
PB: predicated region body
PF: predicated region fallthrough
CT: control target
= control target key end

     0   :  { %v169_v3 = vmov 0.0|0.0   ;;  %vm170_vm0 = vmmov 0   ;;  %v171_v6 = vmov 0.0   ;;  %s223_s0 = inlined_call_operand.vmem [shape: f32[8,32], index: 0, kind: input, shape index: {}]   ;;  %s224_s1 = inlined_call_operand.vmem [shape: f32[32,16], index: 1, kind: input, shape index: {}]   ;;  %s225_s2 = inlined_call_operand.vmem [shape: f32[1,16], index: 2, kind: input, shape index: {}]   ;;  %s226_s3 = inlined_call_operand.hbm [shape: f32[8,16], index: 3, kind: output, shape index: {}]  }
   0x1   :  { %v16_v0 = vld [vmem:[%s224_s1] sm:$0xff]  ;;  %v17_v1 = vld [vmem:[%s224_s1 + $0x8] sm:$0xff]  ;;  %v18_v2 = vld [vmem:[%s224_s1 + $0x10] sm:$0xff]  ;;  %135 = vmatprep.subr.bf16.mxu0 %v169_v3  ;;  %132 = vmatprep.mubr.msk.f32.mxu0 %vm170_vm0, %v171_v6 }
   0x2   :  { %v136_v4 = vpack.c.bf16 %v17_v1, %v16_v0  ;;  %v19_v5 = vld [vmem:[%s224_s1 + $0x18] sm:$0xff] }
   0x3   :  { %8 = vsyncpa [#allocation3], 0  ;;  %v139_v7 = vpack.c.bf16 %v19_v5, %v18_v2  ;;  %v15_v8 = vld [vmem:[%s223_s0] sm:$0xff]  ;;  %vm27_vm1 = vcmask 261120   ;;  %s172_s24 = smov [#allocation2]   ;;  %vm101_vm2 = vcmask 130048  }
   0x4   :  { %137 = vmatpush3.bf16.msra.mxu0 %v136_v4  ;;  %v117_v9 = vld [vmem:[%s225_s2] ss:$0 sm:$0xff]  ;;  %s109_s1 = sshll.u32 %s172_s24, 4  ;;  %s110_s1 = int_to_ptr.vmem [resolvable:$true] %s109_s1 }
   0x5   :  { %138 = vmatprep.subr.bf16.mxu0 %v169_v3  ;;  %s145_s25 = scalar_lea.vmem %s110_s1, 128  ;;  %p150_p1 = scmp.lt.s32.totalorder %s110_s1, %s110_s1 }
   0x6   :  { %p146_p0 = scmp.ne.s32.totalorder %s110_s1, %s145_s25  ;;  %p151_p2 = scmp.lt.s32.totalorder %s145_s25, %s145_s25 }
   0x8   :  { %140 = vmatpush3.bf16.msra.mxu0 %v139_v7  ;;  %p152_p3 = por %p151_p2, %p150_p1 }
   0xa   :  { %p153_p4 = pnand %p152_p3, %p146_p0 }
   0xb   :  { %133 = vmatmul.mubr.msk.f32.vlgmr.msra.gmra.mrb[0].mxu0 %vm27_vm1, %v15_v8 }
  0xde   :  { %v97_v10 = vpop.f32.mrb[0].mxu0 }
  0xdf   :  { %v98_v11 = vadd.f32 %v117_v9, %v97_v10  ;;  %v134_v12 = vpop.f32.mrb[1].mxu0 }
  0xe1   :  { %102 = vst.msk [vmem:[#allocation2] sm:$0xff] %vm101_vm2, %v98_v11 }
  0xe2   :  { %156 = shalt.err (!%p153_p4)
}
  0xe3   :  { %s157_s27 = scalar_lea.hbm %s226_s3, 128 }
  0xe4   :  { %p158_p5 = scmp.ne.s32.totalorder %s226_s3, %s157_s27  ;;  %p161_p6 = scmp.lt.u32.totalorder %s157_s27, %s226_s3 }
  0xe6   :  { %p163_p7 = pnand %p161_p6, %p158_p5 }
  0xe8   :  { %166 = shalt.err (!%p163_p7)
}
  0xe9   :  { %112 = dma.vmem_to_hbm [thread:$0]  %s110_s1, 128, %s226_s3, [#allocation3]  }
  0xea   :  { %167 = dma.done.wait [#allocation3], 128  }
  0xeb   :  { %168 = vsyncadd [#allocation3], 4294967168 }
  0xec   :  { %116 = vsyncpa [#allocation3], 1 }

</bundles_post_ra>
